<compile_context>
chip_gen: v6e
topology: v6e:2x2x1
jax: 0.10.0
libtpu: 0.0.40
codegen_flags: <defaults>
</compile_context>

<pallas_src>
import math

import jax
import jax.numpy as jnp
from jax.experimental import pallas as pl
from jax.experimental.pallas import tpu as pltpu


def _round_up(x, m):
    return ((x + m - 1) // m) * m


def _tensorcores_per_chip():
    """v7x chips expose 2 TensorCores; the 'parallel' grid axis shards over them."""
    try:
        kind = jax.devices()[0].device_kind.lower()
    except Exception:
        return 1
    return 2 if ("v7" in kind or "7x" in kind) else 1


def _choose_tile(batch, *, max_tile, min_steps):
    """Rows per grid step: as large as possible, multiple of 16, >= min_steps steps."""
    # Tiny batches: single step whose block is exactly the full (possibly odd) batch.
    if batch <= max_tile and (min_steps <= 1 or batch < 32):
        return batch
    steps = max(min_steps, pl.cdiv(batch, max_tile))
    tile = _round_up(pl.cdiv(batch, steps), 16)
    return min(tile, max_tile)


def qnetwork_kernel(s_ref, a_ref,
                    w1s_ref, w1a_ref, b1_ref,
                    w2_ref, b2_ref,
                    w3_ref, b3_ref,
                    out_ref):
    # bf16 MXU operands (no-op if inputs already bf16), f32 accumulation.
    s = s_ref[...].astype(jnp.bfloat16)
    a = a_ref[...].astype(jnp.bfloat16)

    # Layer 1: split-GEMM replaces cat([s, a], -1) @ W1 (no lane-axis concat).
    h1 = (jnp.dot(s, w1s_ref[...], preferred_element_type=jnp.float32)
          + jnp.dot(a, w1a_ref[...], preferred_element_type=jnp.float32)
          + b1_ref[...])
    h1 = jnp.maximum(h1, 0.0)

    # Layer 2: Linear(256, 256) + ReLU on the MXU.
    h2 = jnp.dot(h1.astype(jnp.bfloat16), w2_ref[...],
                 preferred_element_type=jnp.float32) + b2_ref[...]
    h2 = jnp.maximum(h2, 0.0)

    # Layer 3: Linear(256, 1) on VPU + XLU (N=1 matmul would waste a full MXU
    # pass); w3 is passed as a [1, hidden] row, b3 is a scalar in SMEM.
    q = jnp.sum(h2 * w3_ref[...], axis=-1, keepdims=True) + b3_ref[0, 0]
    out_ref[...] = q.astype(out_ref.dtype)


def qnetwork_forward(s, a, params, *, tile_m=4096):
    """s: [B, obs_dim], a: [B, act_dim] -> q: [B, 1].

    s/a may be float32 or bfloat16 (bf16 halves the dominant HBM read stream).
    """
    w1s, w1a, b1, w2, b2, w3_row, b3 = params
    B, obs_dim = s.shape
    act_dim = a.shape[1]
    hidden = w2.shape[0]

    tm = _choose_tile(B, max_tile=tile_m, min_steps=_tensorcores_per_chip())
    grid = (pl.cdiv(B, tm),)

    def batch_spec(feat):
        return pl.BlockSpec((tm, feat), lambda i: (i, 0))

    def resident(shape):
        # Constant index_map -> fetched once, VMEM-resident across grid steps.
        return pl.BlockSpec(shape, lambda i: (0, 0))

    out = pl.pallas_call(
        qnetwork_kernel,
        out_shape=jax.ShapeDtypeStruct((B, 1), jnp.float32),
        grid=grid,
        in_specs=[
            batch_spec(obs_dim),                     # s  tile
            batch_spec(act_dim),                     # a  tile
            resident((obs_dim, hidden)),             # w1_s (VMEM-resident)
            resident((act_dim, hidden)),             # w1_a
            resident((1, hidden)),                   # b1
            resident((hidden, hidden)),              # w2
            resident((1, hidden)),                   # b2
            resident((1, hidden)),                   # w3 row (VPU layer 3)
            pl.BlockSpec((1, 1), lambda i: (0, 0),   # b3 scalar in SMEM
                         memory_space=pltpu.MemorySpace.SMEM),
        ],
        out_specs=pl.BlockSpec((tm, 1), lambda i: (i, 0)),
        compiler_params=pltpu.CompilerParams(
            dimension_semantics=("parallel",),
            vmem_limit_bytes=32 << 20,
        ),
    )(s, a, w1s, w1a, b1, w2, b2, w3_row, b3)

    return out


def init_linear(key, fan_in, fan_out):
    """Deterministic init matching torch.nn.Linear default (U[-1/sqrt(fan_in), ..])."""
    kw, kb = jax.random.split(key)
    bound = 1.0 / math.sqrt(fan_in)
    # Stored as [in, out] so the kernel computes x @ W directly.
    w = jax.random.uniform(kw, (fan_in, fan_out), jnp.float32, -bound, bound)
    b = jax.random.uniform(kb, (1, fan_out), jnp.float32, -bound, bound)
    return w, b


def make_params(key, obs_dim, act_dim, hidden=256):
    k1, k2, k3 = jax.random.split(key, 3)
    # Layer 1 initialized as a single Linear(obs+act, hidden), then split so
    # the kernel can do a split-GEMM instead of an in-kernel concat.
    w1, b1 = init_linear(k1, obs_dim + act_dim, hidden)
    w2, b2 = init_linear(k2, hidden, hidden)
    w3, b3 = init_linear(k3, hidden, 1)
    w1s = w1[:obs_dim].astype(jnp.bfloat16)
    w1a = w1[obs_dim:].astype(jnp.bfloat16)
    w3_row = w3.T                      # [1, hidden], kept f32 (VPU layer 3)
    return (w1s, w1a, b1,
            w2.astype(jnp.bfloat16), b2,
            w3_row, b3)


def reference_forward(s, a, params):
    """Pure-JAX reference with identical bf16-operand / f32-accum math."""
    w1s, w1a, b1, w2, b2, w3_row, b3 = params
    f32 = jnp.float32
    h1 = (jnp.dot(s.astype(jnp.bfloat16), w1s, preferred_element_type=f32)
          + jnp.dot(a.astype(jnp.bfloat16), w1a, preferred_element_type=f32)
          + b1)
    h1 = jnp.maximum(h1, 0.0)
    h2 = jnp.dot(h1.astype(jnp.bfloat16), w2, preferred_element_type=f32) + b2
    h2 = jnp.maximum(h2, 0.0)
    return jnp.sum(h2 * w3_row, axis=-1, keepdims=True) + b3


if __name__ == "__main__":
    # humanoid-walk (DMC, state-based, flattened): obs_dim=67, act_dim=21.
    obs_dim, act_dim = 67, 21

    key = jax.random.PRNGKey(0)
    k_s, k_a, k_p, k_s2, k_a2 = jax.random.split(key, 5)
    params = make_params(k_p, obs_dim, act_dim)

    # Small-batch case (single grid step, block == full batch).
    batch = 2
    s = jax.random.normal(k_s, (batch, obs_dim), jnp.float32)
    a = jax.random.uniform(k_a, (batch, act_dim), jnp.float32, -1.0, 1.0)
    q = jax.jit(qnetwork_forward)(s, a, params)
    jax.block_until_ready(q)
    q_ref = reference_forward(s, a, params)
    assert q.shape == (batch, 1), q.shape
    assert jnp.allclose(q, q_ref, atol=5e-3, rtol=5e-3), (q, q_ref)

    # Tiled path with a ragged tail (no wrapper-side pad copy).
    batch2 = 300
    s2 = jax.random.normal(k_s2, (batch2, obs_dim), jnp.float32)
    a2 = jax.random.uniform(k_a2, (batch2, act_dim), jnp.float32, -1.0, 1.0)
    q2 = jax.jit(lambda s_, a_, p_: qnetwork_forward(s_, a_, p_, tile_m=128))(
        s2, a2, params)
    jax.block_until_ready(q2)
    q2_ref = reference_forward(s2, a2, params)
    assert q2.shape == (batch2, 1), q2.shape
    assert jnp.allclose(q2, q2_ref, atol=5e-3, rtol=5e-3)

    print("KERNEL_OK")
</pallas_src>

<mosaic_0001>
module attributes {stable_mosaic.version = 11 : i64} {
  func.func @qnetwork_kernel(%arg0: i32, %arg1: memref<2x67xf32, #tpu.memory_space<vmem>>, %arg2: memref<2x21xf32, #tpu.memory_space<vmem>>, %arg3: memref<67x256xbf16, #tpu.memory_space<vmem>>, %arg4: memref<21x256xbf16, #tpu.memory_space<vmem>>, %arg5: memref<1x256xf32, #tpu.memory_space<vmem>>, %arg6: memref<256x256xbf16, #tpu.memory_space<vmem>>, %arg7: memref<1x256xf32, #tpu.memory_space<vmem>>, %arg8: memref<1x256xf32, #tpu.memory_space<vmem>>, %arg9: memref<1x1xf32, #tpu.memory_space<smem>>, %arg10: memref<2x1xf32, #tpu.memory_space<vmem>>) attributes {dimension_semantics = [#tpu.dimension_semantics<parallel>], iteration_bounds = array<i64: 1>, scalar_prefetch = 0 : i64, scratch_operands = 0 : i64, tpu.core_type = #tpu.core_type<tc>, window_params = [{transform_indices = @transform_0, window_bounds = array<i64: 2, 67>}, {transform_indices = @transform_1, window_bounds = array<i64: 2, 21>}, {pipeline_mode = #tpu.pipeline_mode<synchronous>, transform_indices = @transform_2, window_bounds = array<i64: 67, 256>}, {pipeline_mode = #tpu.pipeline_mode<synchronous>, transform_indices = @transform_3, window_bounds = array<i64: 21, 256>}, {pipeline_mode = #tpu.pipeline_mode<synchronous>, transform_indices = @transform_4, window_bounds = array<i64: 1, 256>}, {pipeline_mode = #tpu.pipeline_mode<synchronous>, transform_indices = @transform_5, window_bounds = array<i64: 256, 256>}, {pipeline_mode = #tpu.pipeline_mode<synchronous>, transform_indices = @transform_6, window_bounds = array<i64: 1, 256>}, {pipeline_mode = #tpu.pipeline_mode<synchronous>, transform_indices = @transform_7, window_bounds = array<i64: 1, 256>}, {transform_indices = @transform_8, window_bounds = array<i64: 1, 1>}, {transform_indices = @transform_9, window_bounds = array<i64: 2, 1>}]} {
    %c0 = arith.constant 0 : index
    %c0_0 = arith.constant 0 : index
    %0 = vector.load %arg1[%c0, %c0_0] : memref<2x67xf32, #tpu.memory_space<vmem>>, vector<2x67xf32>
    %1 = arith.truncf %0 : vector<2x67xf32> to vector<2x67xbf16>
    %c0_1 = arith.constant 0 : index
    %c0_2 = arith.constant 0 : index
    %2 = vector.load %arg2[%c0_1, %c0_2] : memref<2x21xf32, #tpu.memory_space<vmem>>, vector<2x21xf32>
    %3 = arith.truncf %2 : vector<2x21xf32> to vector<2x21xbf16>
    %c0_3 = arith.constant 0 : index
    %c0_4 = arith.constant 0 : index
    %4 = vector.load %arg3[%c0_3, %c0_4] : memref<67x256xbf16, #tpu.memory_space<vmem>>, vector<67x256xbf16>
    %cst = arith.constant dense<0.000000e+00> : vector<2x256xf32>
    %5 = tpu.matmul %1, %4, %cst {dimension_numbers = #tpu.dot_dimension_numbers<[1], [0], [0], [1], [0, 0, 1, 1], [], []>} : vector<2x67xbf16>, vector<67x256xbf16>, vector<2x256xf32> -> vector<2x256xf32>
    %c0_5 = arith.constant 0 : index
    %c0_6 = arith.constant 0 : index
    %6 = vector.load %arg4[%c0_5, %c0_6] : memref<21x256xbf16, #tpu.memory_space<vmem>>, vector<21x256xbf16>
    %cst_7 = arith.constant dense<0.000000e+00> : vector<2x256xf32>
    %7 = tpu.matmul %3, %6, %cst_7 {dimension_numbers = #tpu.dot_dimension_numbers<[1], [0], [0], [1], [0, 0, 1, 1], [], []>} : vector<2x21xbf16>, vector<21x256xbf16>, vector<2x256xf32> -> vector<2x256xf32>
    %8 = arith.addf %5, %7 : vector<2x256xf32>
    %c0_8 = arith.constant 0 : index
    %c0_9 = arith.constant 0 : index
    %9 = vector.load %arg5[%c0_8, %c0_9] : memref<1x256xf32, #tpu.memory_space<vmem>>, vector<1x256xf32>
    %10 = vector.broadcast %9 : vector<1x256xf32> to vector<2x256xf32>
    %11 = arith.addf %8, %10 : vector<2x256xf32>
    %cst_10 = arith.constant 0.000000e+00 : f32
    %12 = vector.broadcast %cst_10 : f32 to vector<2x256xf32>
    %13 = arith.maximumf %11, %12 : vector<2x256xf32>
    %14 = arith.truncf %13 : vector<2x256xf32> to vector<2x256xbf16>
    %c0_11 = arith.constant 0 : index
    %c0_12 = arith.constant 0 : index
    %15 = vector.load %arg6[%c0_11, %c0_12] : memref<256x256xbf16, #tpu.memory_space<vmem>>, vector<256x256xbf16>
    %cst_13 = arith.constant dense<0.000000e+00> : vector<2x256xf32>
    %16 = tpu.matmul %14, %15, %cst_13 {dimension_numbers = #tpu.dot_dimension_numbers<[1], [0], [0], [1], [0, 0, 1, 1], [], []>} : vector<2x256xbf16>, vector<256x256xbf16>, vector<2x256xf32> -> vector<2x256xf32>
    %c0_14 = arith.constant 0 : index
    %c0_15 = arith.constant 0 : index
    %17 = vector.load %arg7[%c0_14, %c0_15] : memref<1x256xf32, #tpu.memory_space<vmem>>, vector<1x256xf32>
    %18 = vector.broadcast %17 : vector<1x256xf32> to vector<2x256xf32>
    %19 = arith.addf %16, %18 : vector<2x256xf32>
    %cst_16 = arith.constant 0.000000e+00 : f32
    %20 = vector.broadcast %cst_16 : f32 to vector<2x256xf32>
    %21 = arith.maximumf %19, %20 : vector<2x256xf32>
    %c0_17 = arith.constant 0 : index
    %c0_18 = arith.constant 0 : index
    %22 = vector.load %arg8[%c0_17, %c0_18] : memref<1x256xf32, #tpu.memory_space<vmem>>, vector<1x256xf32>
    %23 = vector.broadcast %22 : vector<1x256xf32> to vector<2x256xf32>
    %24 = arith.mulf %21, %23 : vector<2x256xf32>
    %cst_19 = arith.constant dense<0.000000e+00> : vector<2xf32>
    %25 = vector.multi_reduction <add>, %24, %cst_19 [1] : vector<2x256xf32> to vector<2xf32>
    %26 = vector.shape_cast %25 : vector<2xf32> to vector<2x1xf32>
    %c0_20 = arith.constant 0 : index
    %c0_21 = arith.constant 0 : index
    %27 = memref.load %arg9[%c0_20, %c0_21] : memref<1x1xf32, #tpu.memory_space<smem>>
    %28 = vector.broadcast %27 : f32 to vector<2x1xf32>
    %29 = arith.addf %26, %28 : vector<2x1xf32>
    %c0_22 = arith.constant 0 : index
    %c0_23 = arith.constant 0 : index
    %30 = vector.load %arg10[%c0_22, %c0_23] : memref<2x1xf32, #tpu.memory_space<vmem>>, vector<2x1xf32>
    tpu.vector_store %arg10[%c0_22, %c0_23], %29 {strides = array<i32>} : memref<2x1xf32, #tpu.memory_space<vmem>>, vector<2x1xf32>,
    return
  }
  func.func @transform_0(%arg0: i32) -> (i32, i32) {
    %c0_i32 = arith.constant 0 : i32
    %c0_i32_0 = arith.constant 0 : i32
    return %arg0, %c0_i32 : i32, i32
  }
  func.func @transform_1(%arg0: i32) -> (i32, i32) {
    %c0_i32 = arith.constant 0 : i32
    %c0_i32_0 = arith.constant 0 : i32
    return %arg0, %c0_i32 : i32, i32
  }
  func.func @transform_2(%arg0: i32) -> (i32, i32) {
    %c0_i32 = arith.constant 0 : i32
    %c0_i32_0 = arith.constant 0 : i32
    %c0_i32_1 = arith.constant 0 : i32
    return %c0_i32, %c0_i32_0 : i32, i32
  }
  func.func @transform_3(%arg0: i32) -> (i32, i32) {
    %c0_i32 = arith.constant 0 : i32
    %c0_i32_0 = arith.constant 0 : i32
    %c0_i32_1 = arith.constant 0 : i32
    return %c0_i32, %c0_i32_0 : i32, i32
  }
  func.func @transform_4(%arg0: i32) -> (i32, i32) {
    %c0_i32 = arith.constant 0 : i32
    %c0_i32_0 = arith.constant 0 : i32
    %c0_i32_1 = arith.constant 0 : i32
    return %c0_i32, %c0_i32_0 : i32, i32
  }
  func.func @transform_5(%arg0: i32) -> (i32, i32) {
    %c0_i32 = arith.constant 0 : i32
    %c0_i32_0 = arith.constant 0 : i32
    %c0_i32_1 = arith.constant 0 : i32
    return %c0_i32, %c0_i32_0 : i32, i32
  }
  func.func @transform_6(%arg0: i32) -> (i32, i32) {
    %c0_i32 = arith.constant 0 : i32
    %c0_i32_0 = arith.constant 0 : i32
    %c0_i32_1 = arith.constant 0 : i32
    return %c0_i32, %c0_i32_0 : i32, i32
  }
  func.func @transform_7(%arg0: i32) -> (i32, i32) {
    %c0_i32 = arith.constant 0 : i32
    %c0_i32_0 = arith.constant 0 : i32
    %c0_i32_1 = arith.constant 0 : i32
    return %c0_i32, %c0_i32_0 : i32, i32
  }
  func.func @transform_8(%arg0: i32) -> (i32, i32) {
    %c0_i32 = arith.constant 0 : i32
    %c0_i32_0 = arith.constant 0 : i32
    %c0_i32_1 = arith.constant 0 : i32
    return %c0_i32, %c0_i32_0 : i32, i32
  }
  func.func @transform_9(%arg0: i32) -> (i32, i32) {
    %c0_i32 = arith.constant 0 : i32
    %c0_i32_0 = arith.constant 0 : i32
    return %arg0, %c0_i32 : i32, i32
  }
}

</mosaic_0001>

<bundles_post_ra>
// kernel: qnetwork_forward.1
= control target key start
LH: loop header
LB: loop body
LE: loop exit
PB: predicated region body
PF: predicated region fallthrough
CT: control target
= control target key end

     0   :  { %15 = vsyncpa [#allocation4], 0  ;;  %s878_s0 = inlined_call_operand.vmem [shape: f32[2,67], index: 0, kind: input, shape index: {}]   ;;  %s879_s1 = inlined_call_operand.hbm [shape: f32[2,21], index: 1, kind: input, shape index: {}]   ;;  %s880_s2 = inlined_call_operand.hbm [shape: bf16[67,256], index: 2, kind: input, shape index: {}]   ;;  %s881_s3 = inlined_call_operand.hbm [shape: bf16[21,256], index: 3, kind: input, shape index: {}]   ;;  %s882_s4 = inlined_call_operand.vmem [shape: f32[1,256], index: 4, kind: input, shape index: {}]   ;;  %s883_s5 = inlined_call_operand.hbm [shape: bf16[256,256], index: 5, kind: input, shape index: {}]   ;;  %s884_s6 = inlined_call_operand.vmem [shape: f32[1,256], index: 6, kind: input, shape index: {}]   ;;  %s885_s7 = inlined_call_operand.vmem [shape: f32[1,256], index: 7, kind: input, shape index: {}]   ;;  %s886_s8 = inlined_call_operand.<no memory space> [shape: f32[1,1], index: 8, kind: input, shape index: {}]   ;;  %s887_s9 = inlined_call_operand.vmem [shape: f32[2,1], index: 9, kind: output, shape index: {}]  }
   0x1   :  { %16 = vsyncpa [#allocation6], 0 }
   0x2   :  { %17 = vsyncpa [#allocation9], 0  ;;  %s777_s30 = smov [#allocation5]  }
   0x3   :  { %s35_s10 = sshll.u32 %s777_s30, 4  ;;  %s36_s10 = int_to_ptr.vmem [resolvable:$true] %s35_s10 }
   0x4   :  { %s699_s11 = scalar_lea.vmem %s36_s10, 1152  ;;  %p704_p1 = scmp.lt.s32.totalorder %s36_s10, %s36_s10 }
   0x5   :  { %p700_p0 = scmp.ne.s32.totalorder %s36_s10, %s699_s11  ;;  %p705_p2 = scmp.lt.s32.totalorder %s699_s11, %s699_s11 }
   0x7   :  { %p706_p3 = por %p705_p2, %p704_p1 }
   0x9   :  { %p707_p4 = pnand %p706_p3, %p700_p0 }
   0xb   :  { %710 = shalt.err (!%p707_p4)
}
   0xc   :  { %s778_s12 = smov 128   ;;  %s779_s13 = smov 8  }
   0xd   :  { %41 = dma.hbm_to_vmem [thread:$0]  %s880_s2, 1152, %s36_s10, [#allocation6], %s778_s12, %s778_s12, %s779_s13  }
   0xe   :  { %s780_s16 = smov [#allocation3]   ;;  %s781_s18 = smov [#allocation7]  }
   0xf   :  { %s26_s17 = sshll.u32 %s780_s16, 4  ;;  %s47_s19 = sshll.u32 %s781_s18, 4  ;;  %s27_s17 = int_to_ptr.vmem [resolvable:$true] %s26_s17  ;;  %s48_s19 = int_to_ptr.vmem [resolvable:$true] %s47_s19 }
  0x10   :  { %s719_s20 = scalar_lea.vmem %s27_s17, 32  ;;  %p724_p6 = scmp.lt.s32.totalorder %s27_s17, %s27_s17 }
  0x11   :  { %p720_p5 = scmp.ne.s32.totalorder %s27_s17, %s719_s20  ;;  %p725_p7 = scmp.lt.s32.totalorder %s719_s20, %s719_s20 }
  0x13   :  { %p726_p8 = por %p725_p7, %p724_p6 }
  0x15   :  { %p727_p9 = pnand %p726_p8, %p720_p5 }
  0x17   :  { %730 = shalt.err (!%p727_p9)
}
  0x18   :  { %29 = dma.hbm_to_vmem [thread:$0]  %s879_s1, 32, %s27_s17, [#allocation4]  }
  0x19   :  { %s739_s23 = scalar_lea.vmem %s48_s19, 384  ;;  %p744_p11 = scmp.lt.s32.totalorder %s48_s19, %s48_s19 }
  0x1a   :  { %p740_p10 = scmp.ne.s32.totalorder %s48_s19, %s739_s23  ;;  %p745_p12 = scmp.lt.s32.totalorder %s739_s23, %s739_s23 }
  0x1c   :  { %p746_p13 = por %p745_p12, %p744_p11 }
  0x1e   :  { %p747_p0 = pnand %p746_p13, %p740_p10 }
  0x20   :  { %750 = shalt.err (!%p747_p0)
}
  0x21   :  { %53 = dma.hbm_to_vmem [thread:$0]  %s881_s3, 384, %s48_s19, [#allocation6], %s778_s12, %s778_s12, %s779_s13  }
  0x22   :  { %s782_s25 = smov [#allocation8]  }
  0x23   :  { %s61_s26 = sshll.u32 %s782_s25, 4  ;;  %s62_s26 = int_to_ptr.vmem [resolvable:$true] %s61_s26 }
  0x24   :  { %s759_s27 = scalar_lea.vmem %s62_s26, 4096  ;;  %p764_p2 = scmp.lt.s32.totalorder %s62_s26, %s62_s26 }
  0x25   :  { %p760_p1 = scmp.ne.s32.totalorder %s62_s26, %s759_s27  ;;  %p765_p3 = scmp.lt.s32.totalorder %s759_s27, %s759_s27 }
  0x27   :  { %p766_p4 = por %p765_p3, %p764_p2 }
  0x29   :  { %p767_p5 = pnand %p766_p4, %p760_p1 }
  0x2b   :  { %770 = shalt.err (!%p767_p5)
}
  0x2c   :  { %67 = dma.hbm_to_vmem [thread:$0]  %s883_s5, 4096, %s62_s26, [#allocation9], %s778_s12, %s778_s12, %s779_s13  }
  0x2d   :  { %771 = dma.done.wait [#allocation4], 32  }
  0x2e   :  { %772 = vsyncadd [#allocation4], 4294967264 }
  0x2f   :  { %773 = dma.done.wait [#allocation6], 1536  }
  0x30   :  { %774 = vsyncadd [#allocation6], 4294965760 }
  0x31   :  { %775 = dma.done.wait [#allocation9], 4096  }
  0x32   :  { %776 = vsyncadd [#allocation9], 4294963200  ;;  %vm122_vm0 = vcmask 1041408   ;;  %v783_v0 = vmov 0   ;;  %vm123_vm1 = vcmask 1042432   ;;  %v784_v1 = vmov 65535  }
  0x33   :  { %164 = vmatprep.mubr.bf16.mxu1 %v783_v0  ;;  %v124_v2 = vsel %vm122_vm0, 4294967295, %v784_v1  ;;  %vm222_vm2 = vcmask 1040384   ;;  %v102_v3 = vld [vmem:[#allocation7 + $0x10] sm:$0x77]  ;;  %v99_v8 = vld [vmem:[#allocation5 + $0x40] sm:$0x33] }
  0x34   :  { %v125_v4 = vsel %vm123_vm1, %v124_v2, 0  ;;  %v571_v5 = vcombine.high %v102_v3, %v102_v3  ;;  %v223_v6 = vsel %vm222_vm2, 4294967295, %v784_v1  ;;  %v570_v7 = vcombine.low %v102_v3, %v102_v3  ;;  %v626_v11 = vld [vmem:[#allocation7 + $0x4] ss:$8 sps:$4 sm:$0xff]   ;;  %v628_v14 = vld [vmem:[#allocation7] ss:$8 sps:$4 sm:$0xff]  }
  0x35   :  { %v582_v12 = vcombine.high %v99_v8, %v99_v8  ;;  %v224_v13 = vsel %vm122_vm0, %v223_v6, 0  ;;  %v89_v15 = vld [vmem:[#allocation3] sm:$0x3]  ;;  %v581_v16 = vcombine.low %v99_v8, %v99_v8  ;;  %v645_v20 = vld [vmem:[#allocation8 + $0x70] ss:$8 sps:$4 sm:$0xff]   ;;  %vm118_vm3 = vcmask 171008  }
  0x36   :  { %v130_v9 = vand.u32 %v571_v5, %v125_v4  ;;  %v127_v10 = vand.u32 %v570_v7, %v125_v4  ;;  %v643_v18 = vld [vmem:[#allocation8 + $0x74] ss:$8 sps:$4 sm:$0xff]   ;;  %v90_v19 = vpack.c.bf16 %v89_v15, %v89_v15  ;;  %v646_v22 = vld [vmem:[#allocation8 + $0x64] ss:$8 sps:$4 sm:$0xff]   ;;  %v648_v24 = vld [vmem:[#allocation8 + $0x60] ss:$8 sps:$4 sm:$0xff]   ;;  %v274_v2 = vlaneseq }
  0x37   :  { %v229_v17 = vand.u32 %v582_v12, %v224_v13  ;;  %v226_v21 = vand.u32 %v581_v16, %v224_v13  ;;  %494 = vmatprep.subr.bf16.mxu0 %v643_v18  ;;  %v633_v23 = vld [vmem:[#allocation5 + $0x34] ss:$8 sps:$4 sm:$0xff]   ;;  %v631_v26 = vld [vmem:[#allocation5 + $0x30] ss:$8 sps:$4 sm:$0xff]   ;;  %v636_v27 = vld [vmem:[#allocation5 + $0x24] ss:$8 sps:$4 sm:$0xff]  }
  0x38   :  { %144 = vmatprep.subr.bf16.mxu1 %v130_v9  ;;  %495 = vmatpush1.bf16.msra.mxu0 %v645_v20  ;;  %v649_v25 = vld [vmem:[#allocation8 + $0x54] ss:$8 sps:$4 sm:$0xff]   ;;  %v651_v28 = vld [vmem:[#allocation8 + $0x50] ss:$8 sps:$4 sm:$0xff]   ;;  %v634_v29 = vld [vmem:[#allocation5 + $0x20] ss:$8 sps:$4 sm:$0xff]  }
  0x39   :  { %145 = vmatpush1.bf16.msra.mxu1 %v127_v10  ;;  %496 = vmatprep.subr.bf16.mxu0 %v646_v22  ;;  %v652_v30 = vld [vmem:[#allocation8 + $0x44] ss:$8 sps:$4 sm:$0xff]   ;;  %v639_v31 = vld [vmem:[#allocation5 + $0x14] ss:$8 sps:$4 sm:$0xff]   ;;  %v654_v32 = vld [vmem:[#allocation8 + $0x40] ss:$8 sps:$4 sm:$0xff]  }
  0x3a   :  { %146 = vmatprep.subr.bf16.mxu1 %v626_v11  ;;  %v655_v33 = vld [vmem:[#allocation8 + $0x34] ss:$8 sps:$4 sm:$0xff]   ;;  %v637_v34 = vld [vmem:[#allocation5 + $0x10] ss:$8 sps:$4 sm:$0xff]   ;;  %v642_v35 = vld [vmem:[#allocation5 + $0x4] ss:$8 sps:$4 sm:$0xff]  }
  0x3b   :  { %v657_v36 = vld [vmem:[#allocation8 + $0x30] ss:$8 sps:$4 sm:$0xff]   ;;  %v658_v37 = vld [vmem:[#allocation8 + $0x24] ss:$8 sps:$4 sm:$0xff]   ;;  %v640_v38 = vld [vmem:[#allocation5] ss:$8 sps:$4 sm:$0xff]  }
  0x3c   :  { %497 = vmatpush1.bf16.msra.mxu0 %v648_v24  ;;  %v87_v39 = vld [vmem:[%s878_s0] sm:$0x3]  ;;  %v660_v40 = vld [vmem:[#allocation8 + $0x20] ss:$8 sps:$4 sm:$0xff]   ;;  %vm218_vm4 = vcmask 547840   ;;  %v275_v3 = vshrl.u32 %v274_v2, 7 }
  0x3d   :  { %147 = vmatpush1.bf16.msra.mxu1 %v628_v14  ;;  %498 = vmatprep.subr.bf16.mxu0 %v649_v25  ;;  %v661_v41 = vld [vmem:[#allocation8 + $0x14] ss:$8 sps:$4 sm:$0xff]   ;;  %v88_v42 = vpack.c.bf16 %v87_v39, %v87_v39  ;;  %v663_v43 = vld [vmem:[#allocation8 + $0x10] ss:$8 sps:$4 sm:$0xff]   ;;  %v664_v44 = vld [vmem:[#allocation8 + $0x4] ss:$8 sps:$4 sm:$0xff]  }
  0x3e   :  { %237 = vmatprep.subr.bf16.mxu1 %v229_v17  ;;  %v666_v45 = vld [vmem:[#allocation8] ss:$8 sps:$4 sm:$0xff]   ;;  %v667_v46 = vld [vmem:[#allocation8 + $0xf4] ss:$8 sps:$4 sm:$0xff]   ;;  %v669_v47 = vld [vmem:[#allocation8 + $0xf0] ss:$8 sps:$4 sm:$0xff]  }
  0x3f   :  { %v670_v48 = vld [vmem:[#allocation8 + $0xe4] ss:$8 sps:$4 sm:$0xff]   ;;  %v672_v49 = vld [vmem:[#allocation8 + $0xe0] ss:$8 sps:$4 sm:$0xff]   ;;  %v673_v50 = vld [vmem:[#allocation8 + $0xd4] ss:$8 sps:$4 sm:$0xff]  }
  0x40   :  { %572 = vmatmul.mubr.msk.bf16.vlgmr.msra.gmra.mxu1 %vm118_vm3, %v90_v19  ;;  %499 = vmatpush1.bf16.msra.mxu0 %v651_v28  ;;  %v675_v51 = vld [vmem:[#allocation8 + $0xd0] ss:$8 sps:$4 sm:$0xff]   ;;  %v676_v52 = vld [vmem:[#allocation8 + $0xc4] ss:$8 sps:$4 sm:$0xff]   ;;  %v678_v53 = vld [vmem:[#allocation8 + $0xc0] ss:$8 sps:$4 sm:$0xff]  }
  0x41   :  { %238 = vmatpush1.bf16.msra.mxu1 %v226_v21  ;;  %263 = vmatprep.mubr.bf16.mxu1 %v783_v0  ;;  %v679_v54 = vld [vmem:[#allocation8 + $0xb4] ss:$8 sps:$4 sm:$0xff]   ;;  %v681_v55 = vld [vmem:[#allocation8 + $0xb0] ss:$8 sps:$4 sm:$0xff]   ;;  %v682_v56 = vld [vmem:[#allocation8 + $0xa4] ss:$8 sps:$4 sm:$0xff]  }
  0x42   :  { %239 = vmatprep.subr.bf16.mxu1 %v633_v23  ;;  %500 = vmatprep.subr.bf16.mxu0 %v652_v30  ;;  %v684_v57 = vld [vmem:[#allocation8 + $0xa0] ss:$8 sps:$4 sm:$0xff]   ;;  %v685_v58 = vld [vmem:[#allocation8 + $0x94] ss:$8 sps:$4 sm:$0xff]   ;;  %v687_v59 = vld [vmem:[#allocation8 + $0x90] ss:$8 sps:$4 sm:$0xff]  }
  0x43   :  { %v688_v60 = vld [vmem:[#allocation8 + $0x84] ss:$8 sps:$4 sm:$0xff]   ;;  %v690_v61 = vld [vmem:[#allocation8 + $0x80] ss:$8 sps:$4 sm:$0xff]   ;;  %v276_v4 = vsub.s32 0, %v275_v3  ;;  %v280_v6 = vsub.s32 1, %v275_v3 }
  0x44   :  { %501 = vmatpush1.bf16.msra.mxu0 %v654_v32  ;;  %v272_v5 = vld [vmem:[%s882_s4] sm:$0x3]  ;;  %vm559_vm5 = vcmask 1024  }
  0x45   :  { %240 = vmatpush1.bf16.msra.mxu1 %v631_v26  ;;  %502 = vmatprep.subr.bf16.mxu0 %v655_v33  ;;  %v277_v7 = vrot.slane %v272_v5, %v276_v4  ;;  %v281_v10 = vrot.slane %v272_v5, %v280_v6  ;;  %v322_v21 = vld [vmem:[%s884_s6] sm:$0x3] }
  0x46   :  { %241 = vmatprep.subr.bf16.mxu1 %v636_v27  ;;  %v327_v22 = vrot.slane %v322_v21, %v276_v4  ;;  %v537_v23 = vld [vmem:[%s885_s7] sm:$0x3]  ;;  %v331_v24 = vrot.slane %v322_v21, %v280_v6 }
  0x47   :  { %v542_v27 = vrot.slane %v537_v23, %v276_v4 }
  0x48   :  { %503 = vmatpush1.bf16.msra.mxu0 %v657_v36 }
  0x49   :  { %242 = vmatpush1.bf16.msra.mxu1 %v634_v29  ;;  %504 = vmatprep.subr.bf16.mxu0 %v658_v37 }
  0x4a   :  { %243 = vmatprep.subr.bf16.mxu1 %v639_v31  ;;  %v546_v31 = vrot.slane %v537_v23, %v280_v6 }
  0x4c   :  { %505 = vmatpush1.bf16.msra.mxu0 %v660_v40  ;;  %v557_v40 = vstv %s886_s8 }
  0x4d   :  { %244 = vmatpush1.bf16.msra.mxu1 %v637_v34  ;;  %506 = vmatprep.subr.bf16.mxu0 %v661_v41 }
  0x4e   :  { %245 = vmatprep.subr.bf16.mxu1 %v642_v35 }
  0x50   :  { %507 = vmatpush1.bf16.msra.mxu0 %v663_v43 }
  0x51   :  { %246 = vmatpush1.bf16.msra.mxu1 %v640_v38  ;;  %508 = vmatprep.subr.bf16.mxu0 %v664_v44 }
  0x54   :  { %583 = vmatmul.mubr.msk.bf16.vlgmr.msra.gmra.mxu1 %vm218_vm4, %v88_v42  ;;  %509 = vmatpush1.bf16.msra.mxu0 %v666_v45 }
  0x55   :  { %510 = vmatprep.subr.bf16.mxu0 %v667_v46 }
  0x58   :  { %511 = vmatpush2.bf16.msra.mxu0 %v669_v47 }
  0x59   :  { %512 = vmatprep.subr.bf16.mxu0 %v670_v48 }
  0x5c   :  { %513 = vmatpush2.bf16.msra.mxu0 %v672_v49 }
  0x5d   :  { %514 = vmatprep.subr.bf16.mxu0 %v673_v50 }
  0x60   :  { %515 = vmatpush2.bf16.msra.mxu0 %v675_v51 }
  0x61   :  { %516 = vmatprep.subr.bf16.mxu0 %v676_v52 }
  0x64   :  { %517 = vmatpush2.bf16.msra.mxu0 %v678_v53 }
  0x65   :  { %518 = vmatprep.subr.bf16.mxu0 %v679_v54 }
  0x68   :  { %519 = vmatpush2.bf16.msra.mxu0 %v681_v55 }
  0x69   :  { %520 = vmatprep.subr.bf16.mxu0 %v682_v56 }
  0x6c   :  { %521 = vmatpush2.bf16.msra.mxu0 %v684_v57 }
  0x6d   :  { %522 = vmatprep.subr.bf16.mxu0 %v685_v58 }
  0x70   :  { %523 = vmatpush2.bf16.msra.mxu0 %v687_v59 }
  0x71   :  { %524 = vmatprep.subr.bf16.mxu0 %v688_v60 }
  0x74   :  { %525 = vmatpush2.bf16.msra.mxu0 %v690_v61 }
 0x100   :  { %v166_v62 = vpop.f32.mrf.mxu1 }
 0x102   :  { %v168_v63 = vpop.f32.mrf.mxu1 }
 0x104   :  { %v170_v0 = vpop.f32.mrf.mxu1 }
 0x106   :  { %v171_v1 = vpop.f32.mrf.mxu1 }
 0x114   :  { %v265_v8 = vpop.f32.mrf.mxu1 }
 0x115   :  { %v266_v9 = vadd.f32 %v265_v8, %v166_v62 }
 0x116   :  { %v267_v11 = vpop.f32.mrf.mxu1 }
 0x117   :  { %v284_v12 = vadd.f32 %v277_v7, %v266_v9  ;;  %v268_v13 = vadd.f32 %v267_v11, %v168_v63 }
 0x118   :  { %v269_v14 = vpop.f32.mrf.mxu1 }
 0x119   :  { %v285_v15 = vadd.f32 %v281_v10, %v268_v13  ;;  %v286_v16 = vmax.f32 %v284_v12, 0.0 }
 0x11a   :  { %v270_v17 = vpop.f32.mrf.mxu1 }
 0x11b   :  { %v287_v18 = vmax.f32 %v285_v15, 0.0  ;;  %v288_v20 = vpack.c.bf16 %v286_v16, %v286_v16 }
 0x11d   :  { %v289_v19 = vpack.c.bf16 %v287_v18, %v287_v18 }
 0x11f   :  { %526 = vmatprep.mubr.bf16.mxu0 %v289_v19 }
 0x120   :  { %527 = vmatmul.mubr.bf16.vlgmr.msra.gmra.mxu0 %v288_v20 }
 0x1e0   :  { %v528_v25 = vpop.f32.mrf.mxu0 }
 0x1e1   :  { %v529_v26 = vadd.f32 %v528_v25, %v327_v22 }
 0x1e2   :  { %v530_v28 = vpop.f32.mrf.mxu0 }
 0x1e3   :  { %v535_v29 = vmax.f32 %v529_v26, 0.0  ;;  %v531_v30 = vadd.f32 %v530_v28, %v331_v24 }
 0x1e4   :  { %v532_v32 = vpop.f32.mrf.mxu0 }
 0x1e5   :  { %v536_v33 = vmax.f32 %v531_v30, 0.0  ;;  %v549_v34 = vmul.f32 %v542_v27, %v535_v29 }
 0x1e6   :  { %v533_v35 = vpop.f32.mrf.mxu0 }
 0x1e7   :  { %v550_v36 = vmul.f32 %v546_v31, %v536_v33  ;;  %v551_v37 = vsel %vm122_vm0, %v549_v34, 0.0 }
 0x1e9   :  { %v552_v38 = vsel %vm122_vm0, %v550_v36, 0.0 }
 0x1ea   :  { %v553_v39 = vadd.f32 %v552_v38, %v551_v37 }
 0x1ec   :  { %554 = vadd.xlane.f32.xlu0 %v553_v39 }
 0x275   :  { %v555_v41 = vpop.xlane.xlu0 %554 }
 0x276   :  { %v558_v42 = vadd.f32 %v557_v40, %v555_v41 }
 0x278   :  { %560 = vst.msk [vmem:[%s887_s9] sm:$0x3] %vm559_vm5, %v558_v42 }
 0x279   :  { %565 = vsyncpa [#allocation4], 1 }
 0x27a   :  { %566 = vsyncpa [#allocation6], 1 }
 0x27b   :  { %567 = vsyncpa [#allocation9], 1 }

</bundles_post_ra>
